<compile_context>
chip_gen: v7x
topology: tpu7x:2x2x1
jax: 0.10.0
libtpu: 0.0.40
codegen_flags: <defaults>
</compile_context>

<pallas_src>
import functools

import jax
import jax.numpy as jnp
from jax.experimental import pallas as pl
from jax.experimental.pallas import tpu as pltpu


def squeeze_block_kernel(x_ref, w1_ref, b1_ref, w2_ref, b2_ref, o_ref, *, inv_hw):
    # x block: (Bt, C, HW) f32. Last dim is the true spatial extent (no padding).
    x = x_ref[...]

    # Global average pool over the spatial dim (first pass over the block).
    pooled = jnp.sum(x, axis=-1) * inv_hw                                  # (Bt, C)

    # FC1 + ReLU : (Bt, C) @ (C, Cr) + (1, Cr)
    h = jnp.dot(pooled, w1_ref[...], preferred_element_type=jnp.float32) + b1_ref[...]
    h = jnp.maximum(h, 0.0)                                                # (Bt, Cr)

    # FC2 : (Bt, Cr) @ (Cr, C) + (1, C)
    s = jnp.dot(h, w2_ref[...], preferred_element_type=jnp.float32) + b2_ref[...]

    # h_sigmoid: relu6(s + 3) / 6
    scale = jnp.clip(s + 3.0, 0.0, 6.0) * (1.0 / 6.0)                      # (Bt, C)

    # Channel-wise rescale (second pass over the block; the only writing pass).
    o_ref[...] = x * scale[:, :, None]


def _vmem_capacity_bytes():
    try:
        cap = getattr(pltpu.get_tpu_info(), "vmem_capacity_bytes", None)
        if cap:
            return int(cap)
    except Exception:
        pass
    return 64 * 1024 * 1024  # conservative fallback: v7x per-TensorCore physical VMEM


def _pick_batch_tile(batch, c, hw, cr, vmem_limit_bytes,
                     target_block_bytes=2 * 1024 * 1024, min_grid_steps=8):
    """Batch rows per grid step.

    Tightest of:
      * input + output x blocks double-buffered (4 copies) must fit the VMEM limit
        after the (double-buffered) weight/bias blocks and fixed headroom;
      * each x block targets ~1-2 MiB (measured >=85% of HBM roofline at that size);
      * keep >= min_grid_steps grid steps when the batch allows (pipelining + both
        v7x TensorCores fed);
      * round down to a multiple of 8 sublanes when possible.
    """
    row_bytes = c * hw * 4
    weight_bytes = 2 * (c * cr + cr + cr * c + c) * 4   # double-buffered weight/bias blocks
    headroom = 4 * 1024 * 1024                          # Mosaic internal scratch, semaphores
    x_budget = max(row_bytes, vmem_limit_bytes - weight_bytes - headroom)
    bt_vmem = max(1, x_budget // (4 * row_bytes))
    bt_size = max(1, target_block_bytes // row_bytes)
    bt_steps = max(1, batch // min_grid_steps)
    bt = min(bt_vmem, bt_size, bt_steps, batch)
    if bt >= 8:
        bt = (bt // 8) * 8
    return max(1, bt)


def squeeze_block(x_nchw, w1, b1, w2, b2):
    """x_nchw: (B, C, H, W) float32. Returns (B, C, H, W) float32."""
    B, C, H, W = x_nchw.shape
    HW = H * W
    Cr = w1.shape[1]

    # Contiguous reshape (layout bitcast under XLA), no HBM copy, no spatial padding.
    x = x_nchw.reshape(B, C, HW)

    vmem_cap = _vmem_capacity_bytes()
    # Leave headroom on v7x's 64 MiB; use more of v5e/v6e's 128 MiB physical VMEM.
    vmem_limit = min(96 * 1024 * 1024, (vmem_cap * 3) // 4)

    Bt = _pick_batch_tile(B, C, HW, Cr, vmem_limit)
    grid = (pl.cdiv(B, Bt),)

    kernel = functools.partial(squeeze_block_kernel, inv_hw=1.0 / HW)

    cost = pl.CostEstimate(
        flops=2 * B * C * HW + 4 * B * C * Cr,
        transcendentals=0,
        bytes_accessed=2 * B * C * HW * 4 + (C * Cr + Cr + Cr * C + C) * 4,
    )

    out = pl.pallas_call(
        kernel,
        out_shape=jax.ShapeDtypeStruct((B, C, HW), jnp.float32),
        grid_spec=pltpu.PrefetchScalarGridSpec(
            num_scalar_prefetch=0,
            grid=grid,
            in_specs=[
                pl.BlockSpec((Bt, C, HW), lambda b: (b, 0, 0)),
                # Weight/bias blocks are grid-invariant (constant index_map), so the
                # pipeline elides their re-DMA; their double-buffer cost is accounted
                # for in _pick_batch_tile instead of using pl.Buffered(1).
                pl.BlockSpec((C, Cr), lambda b: (0, 0)),
                pl.BlockSpec((1, Cr), lambda b: (0, 0)),
                pl.BlockSpec((Cr, C), lambda b: (0, 0)),
                pl.BlockSpec((1, C), lambda b: (0, 0)),
            ],
            out_specs=pl.BlockSpec((Bt, C, HW), lambda b: (b, 0, 0)),
        ),
        compiler_params=pltpu.CompilerParams(
            dimension_semantics=("parallel",),
            vmem_limit_bytes=vmem_limit,
        ),
        cost_estimate=cost,
        # No input_output_aliases: without the padded copy it would alias the caller's
        # (non-donated) x and force a defensive full-HBM copy.
    )(x, w1, b1, w2, b2)

    return out.reshape(B, C, H, W)


def squeeze_block_ref(x_nchw, w1, b1, w2, b2):
    pooled = jnp.mean(x_nchw, axis=(2, 3))                  # (B, C)
    h = jnp.maximum(pooled @ w1 + b1, 0.0)                  # (B, Cr)
    s = h @ w2 + b2                                         # (B, C)
    scale = jnp.clip(s + 3.0, 0.0, 6.0) / 6.0
    return x_nchw * scale[:, :, None, None]


if __name__ == "__main__":
    # SqueezeBlock(exp_size=16, divide=4): FC 16->4, ReLU, FC 4->16, h_sigmoid, rescale.
    B, C, H, W = 2, 16, 8, 8
    Cr = C // 4

    key = jax.random.PRNGKey(0)
    kx, k1, kb1, k2, kb2 = jax.random.split(key, 5)
    x = jax.random.normal(kx, (B, C, H, W), dtype=jnp.float32)
    # weights stored as (in_features, out_features) for direct x @ W
    w1 = jax.random.normal(k1, (C, Cr), dtype=jnp.float32) * 0.1
    b1 = jax.random.normal(kb1, (1, Cr), dtype=jnp.float32) * 0.1
    w2 = jax.random.normal(k2, (Cr, C), dtype=jnp.float32) * 0.1
    b2 = jax.random.normal(kb2, (1, C), dtype=jnp.float32) * 0.1

    out = jax.jit(squeeze_block)(x, w1, b1, w2, b2)
    jax.block_until_ready(out)

    ref = squeeze_block_ref(x, w1, b1, w2, b2)
    assert out.shape == (B, C, H, W)
    assert jnp.allclose(out, ref, atol=1e-5, rtol=1e-5), "mismatch vs reference"

    print("KERNEL_OK")
</pallas_src>

<mosaic_0001>
module attributes {stable_mosaic.version = 11 : i64} {
  func.func @squeeze_block_kernel(%arg0: i32, %arg1: memref<1x16x64xf32, #tpu.memory_space<vmem>>, %arg2: memref<16x4xf32, #tpu.memory_space<vmem>>, %arg3: memref<1x4xf32, #tpu.memory_space<vmem>>, %arg4: memref<4x16xf32, #tpu.memory_space<vmem>>, %arg5: memref<1x16xf32, #tpu.memory_space<vmem>>, %arg6: memref<1x16x64xf32, #tpu.memory_space<vmem>>) attributes {dimension_semantics = [#tpu.dimension_semantics<parallel>], iteration_bounds = array<i64: 2>, scalar_prefetch = 0 : i64, scratch_operands = 0 : i64, tpu.core_type = #tpu.core_type<tc>, window_params = [{transform_indices = @transform_0, window_bounds = array<i64: 1, 16, 64>}, {pipeline_mode = #tpu.pipeline_mode<synchronous>, transform_indices = @transform_1, window_bounds = array<i64: 16, 4>}, {pipeline_mode = #tpu.pipeline_mode<synchronous>, transform_indices = @transform_2, window_bounds = array<i64: 1, 4>}, {pipeline_mode = #tpu.pipeline_mode<synchronous>, transform_indices = @transform_3, window_bounds = array<i64: 4, 16>}, {pipeline_mode = #tpu.pipeline_mode<synchronous>, transform_indices = @transform_4, window_bounds = array<i64: 1, 16>}, {transform_indices = @transform_5, window_bounds = array<i64: 1, 16, 64>}]} {
    %c0 = arith.constant 0 : index
    %c0_0 = arith.constant 0 : index
    %c0_1 = arith.constant 0 : index
    %0 = vector.load %arg1[%c0, %c0_0, %c0_1] : memref<1x16x64xf32, #tpu.memory_space<vmem>>, vector<1x16x64xf32>
    %cst = arith.constant dense<0.000000e+00> : vector<1x16xf32>
    %1 = vector.multi_reduction <add>, %0, %cst [2] : vector<1x16x64xf32> to vector<1x16xf32>
    %cst_2 = arith.constant 1.562500e-02 : f32
    %2 = vector.broadcast %cst_2 : f32 to vector<1x16xf32>
    %3 = arith.mulf %1, %2 : vector<1x16xf32>
    %c0_3 = arith.constant 0 : index
    %c0_4 = arith.constant 0 : index
    %4 = vector.load %arg2[%c0_3, %c0_4] : memref<16x4xf32, #tpu.memory_space<vmem>>, vector<16x4xf32>
    %cst_5 = arith.constant dense<0.000000e+00> : vector<1x4xf32>
    %5 = tpu.matmul %3, %4, %cst_5 {dimension_numbers = #tpu.dot_dimension_numbers<[1], [0], [0], [1], [0, 0, 1, 1], [], []>} : vector<1x16xf32>, vector<16x4xf32>, vector<1x4xf32> -> vector<1x4xf32>
    %c0_6 = arith.constant 0 : index
    %c0_7 = arith.constant 0 : index
    %6 = vector.load %arg3[%c0_6, %c0_7] : memref<1x4xf32, #tpu.memory_space<vmem>>, vector<1x4xf32>
    %7 = arith.addf %5, %6 : vector<1x4xf32>
    %cst_8 = arith.constant 0.000000e+00 : f32
    %8 = vector.broadcast %cst_8 : f32 to vector<1x4xf32>
    %9 = arith.maximumf %7, %8 : vector<1x4xf32>
    %c0_9 = arith.constant 0 : index
    %c0_10 = arith.constant 0 : index
    %10 = vector.load %arg4[%c0_9, %c0_10] : memref<4x16xf32, #tpu.memory_space<vmem>>, vector<4x16xf32>
    %cst_11 = arith.constant dense<0.000000e+00> : vector<1x16xf32>
    %11 = tpu.matmul %9, %10, %cst_11 {dimension_numbers = #tpu.dot_dimension_numbers<[1], [0], [0], [1], [0, 0, 1, 1], [], []>} : vector<1x4xf32>, vector<4x16xf32>, vector<1x16xf32> -> vector<1x16xf32>
    %c0_12 = arith.constant 0 : index
    %c0_13 = arith.constant 0 : index
    %12 = vector.load %arg5[%c0_12, %c0_13] : memref<1x16xf32, #tpu.memory_space<vmem>>, vector<1x16xf32>
    %13 = arith.addf %11, %12 : vector<1x16xf32>
    %cst_14 = arith.constant 3.000000e+00 : f32
    %14 = vector.broadcast %cst_14 : f32 to vector<1x16xf32>
    %15 = arith.addf %13, %14 : vector<1x16xf32>
    %cst_15 = arith.constant 0.000000e+00 : f32
    %cst_16 = arith.constant 6.000000e+00 : f32
    %16 = vector.broadcast %cst_15 : f32 to vector<1x16xf32>
    %17 = arith.maximumf %16, %15 : vector<1x16xf32>
    %18 = vector.broadcast %cst_16 : f32 to vector<1x16xf32>
    %19 = arith.minimumf %18, %17 : vector<1x16xf32>
    %cst_17 = arith.constant 0.166666672 : f32
    %20 = vector.broadcast %cst_17 : f32 to vector<1x16xf32>
    %21 = arith.mulf %19, %20 : vector<1x16xf32>
    %22 = vector.shape_cast %21 : vector<1x16xf32> to vector<1x16x1xf32>
    %23 = vector.broadcast %22 : vector<1x16x1xf32> to vector<1x16x64xf32>
    %24 = arith.mulf %0, %23 : vector<1x16x64xf32>
    %c0_18 = arith.constant 0 : index
    %c0_19 = arith.constant 0 : index
    %c0_20 = arith.constant 0 : index
    %25 = vector.load %arg6[%c0_18, %c0_19, %c0_20] : memref<1x16x64xf32, #tpu.memory_space<vmem>>, vector<1x16x64xf32>
    tpu.vector_store %arg6[%c0_18, %c0_19, %c0_20], %24 {strides = array<i32>} : memref<1x16x64xf32, #tpu.memory_space<vmem>>, vector<1x16x64xf32>,
    return
  }
  func.func @transform_0(%arg0: i32) -> (i32, i32, i32) {
    %c0_i32 = arith.constant 0 : i32
    %c0_i32_0 = arith.constant 0 : i32
    %c0_i32_1 = arith.constant 0 : i32
    return %arg0, %c0_i32, %c0_i32_0 : i32, i32, i32
  }
  func.func @transform_1(%arg0: i32) -> (i32, i32) {
    %c0_i32 = arith.constant 0 : i32
    %c0_i32_0 = arith.constant 0 : i32
    %c0_i32_1 = arith.constant 0 : i32
    return %c0_i32, %c0_i32_0 : i32, i32
  }
  func.func @transform_2(%arg0: i32) -> (i32, i32) {
    %c0_i32 = arith.constant 0 : i32
    %c0_i32_0 = arith.constant 0 : i32
    %c0_i32_1 = arith.constant 0 : i32
    return %c0_i32, %c0_i32_0 : i32, i32
  }
  func.func @transform_3(%arg0: i32) -> (i32, i32) {
    %c0_i32 = arith.constant 0 : i32
    %c0_i32_0 = arith.constant 0 : i32
    %c0_i32_1 = arith.constant 0 : i32
    return %c0_i32, %c0_i32_0 : i32, i32
  }
  func.func @transform_4(%arg0: i32) -> (i32, i32) {
    %c0_i32 = arith.constant 0 : i32
    %c0_i32_0 = arith.constant 0 : i32
    %c0_i32_1 = arith.constant 0 : i32
    return %c0_i32, %c0_i32_0 : i32, i32
  }
  func.func @transform_5(%arg0: i32) -> (i32, i32, i32) {
    %c0_i32 = arith.constant 0 : i32
    %c0_i32_0 = arith.constant 0 : i32
    %c0_i32_1 = arith.constant 0 : i32
    return %arg0, %c0_i32, %c0_i32_0 : i32, i32, i32
  }
}

</mosaic_0001>

<bundles_post_ra>
// kernel: squeeze_block.1
= control target key start
LH: loop header
LB: loop body
LE: loop exit
PB: predicated region body
PF: predicated region fallthrough
CT: control target
= control target key end

     0   :  { %s570_s18 = smov 0   ;;  %s613_s0 = inlined_call_operand.vmem [shape: f32[2,16,64], index: 0, kind: input, shape index: {}]   ;;  %s614_s1 = inlined_call_operand.vmem [shape: f32[16,4], index: 1, kind: input, shape index: {}]   ;;  %s615_s2 = inlined_call_operand.vmem [shape: f32[1,4], index: 2, kind: input, shape index: {}]   ;;  %s616_s3 = inlined_call_operand.vmem [shape: f32[4,16], index: 3, kind: input, shape index: {}]   ;;  %s617_s4 = inlined_call_operand.vmem [shape: f32[1,16], index: 4, kind: input, shape index: {}]   ;;  %s618_s5 = inlined_call_operand.vmem [shape: f32[2,16,64], index: 5, kind: output, shape index: {}]  }
   0x1 LB: > { %s482_s19 = sadd.s32 4294967295, %s535_s18   ;;  %p486_p0 = scmp.ge.s32.totalorder %s535_s18, 1  ;;  %s535_s18 = sphi %s570_s18, %s15_s18  }
   0x2   : > { %p187_p1 = scmp.lt.s32.totalorder %s535_s18, 3 }
   0x4   : > { %p188_p2 = pnand %p486_p0, %p187_p1 }
   0x5   : > { %p215_p3 = scmp.lt.s32.totalorder (!%p188_p2), %s482_s19, 1  ;;  %vm227_vm0 = vcmask (!%p188_p2), 523264   ;;  %v236_v4 = vld [vmem:[%s614_s1] sm:$0xff] (!%p188_p2)  ;;  %v237_v5 = vld [vmem:[%s614_s1 + $0x8] sm:$0xff] (!%p188_p2)  ;;  %v537_v7 = vmov (!%p188_p2), 0.0|0.0   ;;  %vm538_vm1 = vmmov (!%p188_p2), 0   ;;  %v241_v9 = vlaneseq (!%p188_p2) }
   0x6   : > { %191 = sbr.rel (%p188_p2) target bundleno = 731 (0x2db), region = 40  ;;  %v516_v6 = vpack.c.bf16 (!%p188_p2), %v237_v5, %v236_v4  ;;  %515 = vmatprep.subr.bf16.mxu0 (!%p188_p2), %v537_v7  ;;  %v539_v8 = vmov (!%p188_p2), 0.0   ;;  %vm252_vm2 = vcmask (!%p188_p2), 130112   ;;  %vm254_vm3 = vcmask (!%p188_p2), 130048   ;;  %v328_v22 = vld [vmem:[%s616_s3] sm:$0xf] (!%p188_p2) }
   0x7   : > { %507 = vmatprep.mubr.msk.f32.mxu0 (!%p188_p2), %vm538_vm1, %v539_v8  ;;  %510 = vmatprep.subr.mxu1 (!%p188_p2), %v539_v8  ;;  %v242_v10 = vand.u32 (!%p188_p2), 127, %v241_v9  ;;  %v244_v11 = vshrl.u32 (!%p188_p2), %v241_v9, 7  ;;  %vm334_vm4 = vcmask (!%p188_p2), 1043456   ;;  %v238_v23 = vld [vmem:[%s615_s2] sm:$0x1] (!%p188_p2)  ;;  %vm330_vm5 = vcmask (!%p188_p2), 31744  }
   0x8   : > { %517 = vmatpush3.bf16.msra.mxu0 (!%p188_p2), %v516_v6  ;;  %512 = vmatprep.mubr.msk.f32.mxu1 (!%p188_p2), %vm538_vm1, %v539_v8  ;;  %v329_v28 = vld [vmem:[%s617_s4] sm:$0x1] (!%p188_p2) }
   0x9   : > { %v247_v12 = vadd.s32 (!%p188_p2), 4294967288, %v242_v10  ;;  %v245_v14 = vsub.s32 (!%p188_p2), %v242_v10, %v244_v11  ;;  %511 = vmatpush3.msk.msra.mxu1 (!%p188_p2), %vm334_vm4, %v328_v22  ;;  %v414_v35 = vsub.s32 (!%p188_p2), 0, %v244_v11 }
   0xb   : > { %v250_v16 = vsub.s32 (!%p188_p2), %v247_v12, %v244_v11 }
   0xd   : > { %s620_s19 = smov (!%p215_p3, %s482_s19), 1 }
   0xe   : > { %s496_s20 = sshll.u32 %s620_s19, 4 }
   0xf   : > { %s219_s23 = scalar_lea.vmem %s613_s0, %s496_s20  ;;  %s224_s11 = scalar_lea.vmem %s618_s5, %s496_s20 }
  0x10   : > { %v225_v0 = vld [vmem:[%s219_s23] sm:$0xff]  ;;  %v226_v1 = vld [vmem:[%s219_s23 + $0x8] sm:$0xff] }
  0x11   : > { %v228_v2 = vsel %vm227_vm0, %v225_v0, 0.0  ;;  %v231_v3 = vsel %vm227_vm0, %v226_v1, 0.0 }
  0x12   : > { %229 = vadd.xlane.f32.xlu0 %v228_v2 }
  0x16   : > { %232 = vadd.xlane.f32.xlu0 %v231_v3 }
  0x9f   : > { %v230_v13 = vpop.xlane.xlu0 %229 }
  0xa0   : > { %v234_v15 = vmul.f32 0.015625, %v230_v13 }
  0xa2   : > { %v246_v19 = vrot.slane %v234_v15, %v245_v14 }
  0xa3   : > { %v233_v17 = vpop.xlane.xlu0 %232 }
  0xa4   : > { %v235_v18 = vmul.f32 0.015625, %v233_v17 }
  0xa6   : > { %v251_v20 = vrot.slane %v235_v18, %v250_v16 }
  0xa8   : > { %v253_v21 = vsel %vm252_vm2, %v251_v20, %v246_v19 }
  0xa9   : > { %508 = vmatmul.mubr.msk.f32.vlgmr.msra.gmra.mrb[0].mxu0 %vm254_vm3, %v253_v21 }
 0x17c   : > { %v323_v24 = vpop.f32.mrb[0].mxu0 }
 0x17d   : > { %v324_v25 = vadd.f32 %v323_v24, %v238_v23  ;;  %v509_v26 = vpop.f32.mrb[1].mxu0 }
 0x17f   : > { %v327_v27 = vmax.f32 %v324_v25, 0.0 }
 0x181   : > { %513 = vmatmul.mubr.msk.f32.vlgmr.msra.gmra.mrb[0].mxu1 %vm330_vm5, %v327_v27 }
 0x254   : > { %v404_v29 = vpop.f32.mrb[0].mxu1 }
 0x255   : > { %v405_v30 = vadd.f32 %v404_v29, %v329_v28  ;;  %v514_v31 = vpop.f32.mrb[1].mxu1 }
 0x257   : > { %v408_v32 = vadd.f32 3.0, %v405_v30 }
 0x259   : > { %v409_v33 = vmax.f32 %v408_v32, 0.0 }
 0x25b   : > { %v410_v34 = vmin.f32 %v409_v33, 6.0 }
 0x25d   : > { %v411_v36 = vmul.f32 0.16666667, %v410_v34 }
 0x25f   : > { %v415_v37 = vrot.slane %v411_v36, %v414_v35 }
 0x261   : > { %417 = vbcast.lane.b32.xlu1 %v415_v37, 256 }
 0x265   : > { %421 = vbcast.lane.b32.xlu1 %v415_v37, 264 }
 0x2d3   : > { %v418_v38 = vpop.permute.xlu1 %417 }
 0x2d4   : > { %v423_v39 = vmul.f32 %v418_v38, %v225_v0 }
 0x2d6   : > { %425 = vst.msk [vmem:[%s224_s11] sm:$0xff] %vm227_vm0, %v423_v39 }
 0x2d7   : > { %v422_v40 = vpop.permute.xlu1 %421 }
 0x2d8   : > { %v424_v41 = vmul.f32 %v422_v40, %v226_v1 }
 0x2da   : > { %426 = vst.msk [vmem:[%s224_s11 + $0x8] sm:$0xff] %vm227_vm0, %v424_v41 }
 0x2db PF: > { %s15_s18 = sadd.s32 1, %s535_s18  }
 0x2dc   : > { %p12_p4 = scmp.ge.s32.totalorder %s15_s18, 4  }
 0x2de   :  { %14 = sbr.rel (!%p12_p4) target bundleno = 1 (0x1), region = 70 }

</bundles_post_ra>
